<compile_context>
chip_gen: v7x
topology: tpu7x:2x2x1
jax: 0.10.0
libtpu: 0.0.40
codegen_flags: <defaults>
</compile_context>

<pallas_src>
from types import SimpleNamespace

import jax
import jax.numpy as jnp
from jax.experimental import pallas as pl
from jax.experimental.pallas import tpu as pltpu


def _round_up(x, m):
    return ((x + m - 1) // m) * m


# ---------------------------------------------------------------------------
# Pallas kernel: per-token score = LogSoftmax(Linear(LayerNorm(x)))[..., 0]
# LayerNorm affine folded into the linear layer:
#   z_k = sum(x_hat * (gamma * w_k)) + (b_k + dot(beta, w_k))
# ---------------------------------------------------------------------------
def _token_score_kernel(x_ref, w_ref, b_ref, out_ref):
    # x_ref:   (TN, D)  tile of flattened (B*(L-1), D) image tokens (no CLS)
    # w_ref:   (2, D)   gamma-folded Linear weight (float32)
    # b_ref:   (1, 2)   beta-folded Linear bias   (float32)
    # out_ref: (TN, 1)  log_softmax(z)[..., 0]
    x = x_ref[...].astype(jnp.float32)

    # LayerNorm normalization (eps = 1e-5, nn.LayerNorm default); affine is folded into w/b.
    mean = jnp.mean(x, axis=-1, keepdims=True)
    xc = x - mean
    var = jnp.mean(xc * xc, axis=-1, keepdims=True)
    x_hat = xc * jax.lax.rsqrt(var + 1e-5)

    # Linear(D, 2): only 2 output channels -> two VPU multiplies + XLU lane reductions.
    # (Deliberately NOT an MXU matmul: 2 output columns would waste the systolic array.)
    w = w_ref[...]
    b = b_ref[...]
    z0 = jnp.sum(x_hat * w[0:1, :], axis=-1, keepdims=True) + b[:, 0:1]   # (TN, 1)
    z1 = jnp.sum(x_hat * w[1:2, :], axis=-1, keepdims=True) + b[:, 1:2]   # (TN, 1)

    # log_softmax over the 2 classes, keep channel 0
    m = jnp.maximum(z0, z1)
    lse = m + jnp.log(jnp.exp(z0 - m) + jnp.exp(z1 - m))
    out_ref[...] = (z0 - lse).astype(out_ref.dtype)


def token_scores_pallas(x_flat, w_fold, b_fold, *, max_tile_rows=1024):
    """x_flat: (N, D) float dtype -> (N,) float32 log-softmax channel-0 scores."""
    N, D = x_flat.shape

    # --- tile sizing --------------------------------------------------------
    # Biggest row tile that (a) covers N when N is small, (b) keeps double-buffered
    # input VMEM under ~8 MiB (fits comfortably inside v7x's 64 MiB / 32 MiB scoped),
    # and (c) leaves >= 2 grid steps when there is enough work (v7x megacore).
    itemsize = jnp.dtype(x_flat.dtype).itemsize
    tile_rows = min(max_tile_rows, _round_up(N, 8))
    vmem_budget = 8 * 1024 * 1024
    while tile_rows > 8 and 2 * tile_rows * D * itemsize > vmem_budget:
        tile_rows //= 2
    tile_rows = max(8, _round_up(tile_rows, 8))
    if N >= 256:
        tile_rows = min(tile_rows, _round_up(pl.cdiv(N, 2), 8))

    N_pad = _round_up(N, tile_rows)
    if N_pad != N:
        # Padded rows are all-zero; LayerNorm of zeros is finite (var=0 -> rsqrt(eps)),
        # and the padded scores are sliced off below before any top_k.
        x_flat = jnp.pad(x_flat, ((0, N_pad - N), (0, 0)))

    grid = (N_pad // tile_rows,)
    out = pl.pallas_call(
        _token_score_kernel,
        out_shape=jax.ShapeDtypeStruct((N_pad, 1), jnp.float32),
        grid_spec=pltpu.PrefetchScalarGridSpec(
            num_scalar_prefetch=0,
            grid=grid,
            in_specs=[
                pl.BlockSpec((tile_rows, D), lambda i: (i, 0)),   # x tile
                pl.BlockSpec((2, D), lambda i: (0, 0)),           # folded linear weight
                pl.BlockSpec((1, 2), lambda i: (0, 0)),           # folded linear bias
            ],
            out_specs=pl.BlockSpec((tile_rows, 1), lambda i: (i, 0)),
        ),
        compiler_params=pltpu.CompilerParams(
            dimension_semantics=("parallel",),
            vmem_limit_bytes=32 * 1024 * 1024,
        ),
    )(x_flat, w_fold, b_fold)
    return out[:N, 0]


# ---------------------------------------------------------------------------
# TokenPruner forward (eval path)
# ---------------------------------------------------------------------------
def token_pruner_forward(params, config, layer_idx, text_states, text_mask,
                         image_states, image_mask, cross_attn, previous_keep_mask):
    keep_ratios = {layer: config.keep_ratio ** i
                   for i, layer in enumerate(config.prune_layers, 1)}
    if (not config.prune_layers) or (layer_idx not in config.prune_layers) or (not keep_ratios):
        return image_states, image_mask, previous_keep_mask, None

    batch_size = text_states.shape[0]
    image_len = image_states.shape[1]
    image_hidden_size = image_states.shape[-1]

    image_states_no_cls = image_states[:, 1:]          # (B, L-1, D)
    cls_states = image_states[:, :1]                   # (B, 1, D)

    p = params[str(layer_idx)]
    Lm1 = image_len - 1
    # NOTE: no fp32 pre-cast here — the kernel casts on load, so bf16 inputs read half the HBM bytes.
    x_flat = image_states_no_cls.reshape(batch_size * Lm1, image_hidden_size)

    # Fold the LayerNorm affine into the Linear layer (done once, algebraically exact):
    #   z_k = (x_hat*gamma + beta) @ w_k + b_k = x_hat @ (gamma*w_k) + (beta @ w_k + b_k)
    gamma = p["ln_gamma"].astype(jnp.float32)           # (D,)
    beta = p["ln_beta"].astype(jnp.float32)             # (D,)
    w = p["lin_w"].astype(jnp.float32)                  # (2, D)
    b = p["lin_b"].astype(jnp.float32)                  # (2,)
    w_fold = w * gamma[None, :]                         # (2, D)
    b_fold = (b + w @ beta).reshape(1, 2)               # (1, 2)

    # Hot path in Pallas: LayerNorm -> Linear(D,2) -> LogSoftmax[:, 0]
    scores_flat = token_scores_pallas(x_flat, w_fold, b_fold)
    scores = scores_flat.reshape(batch_size, Lm1)       # == token_scores[:, :, 0]

    # Eval branch: top-k keep, gather, concat CLS (matches the PyTorch eval path exactly,
    # including num_keep_tokens using config.keep_ratio directly and ignoring image_mask).
    num_keep_tokens = int(image_len * config.keep_ratio)
    topk_values, keep_idx = jax.lax.top_k(scores, num_keep_tokens)            # (B, K)
    t_idx = keep_idx[:, :, None]                                              # (B, K, 1)
    img_states = jnp.take_along_axis(image_states_no_cls, t_idx, axis=1)      # (B, K, D)
    new_img_states = jnp.concatenate([cls_states, img_states], axis=1)        # (B, K+1, D)
    new_img_mask = jnp.ones((batch_size, num_keep_tokens + 1), dtype=jnp.int32)
    previous_keep_mask = keep_idx                                             # matches original
    layer_keep_info = (scores, topk_values)
    return new_img_states, new_img_mask, previous_keep_mask, layer_keep_info


# ---------------------------------------------------------------------------
# Deterministic parameter init (synthetic, per prune layer)
# ---------------------------------------------------------------------------
def init_params(key, config):
    embed_dim = getattr(config, "encoder_width", config.hidden_size)
    params = {}
    for layer in config.prune_layers:
        k1, k2, key = jax.random.split(key, 3)
        params[str(layer)] = {
            "ln_gamma": jnp.ones((embed_dim,), jnp.float32),
            "ln_beta": jnp.zeros((embed_dim,), jnp.float32),
            # nn.Linear(embed_dim, 2): weight (2, embed_dim), bias (2,)
            "lin_w": (jax.random.uniform(k1, (2, embed_dim), jnp.float32, -1.0, 1.0)
                      / jnp.sqrt(embed_dim)),
            "lin_b": (jax.random.uniform(k2, (2,), jnp.float32, -1.0, 1.0)
                      / jnp.sqrt(embed_dim)),
        }
    return params


if __name__ == "__main__":
    config = SimpleNamespace(
        prune_layers=[3],
        keep_ratio=0.5,
        hidden_size=32,
        contrast_method="none",
        ib_kl=False,
        prune_method="linear_states",
    )

    key = jax.random.PRNGKey(0)
    kp, kt, ki, ka = jax.random.split(key, 4)
    params = init_params(kp, config)

    B, T, L, D, H = 2, 8, 17, 32, 12          # L = 1 CLS + 16 image tokens
    text_states = jax.random.normal(kt, (B, T, D), jnp.float32)
    text_mask = jnp.ones((B, T), jnp.int32)
    image_states = jax.random.normal(ki, (B, L, D), jnp.float32)
    image_mask = jnp.ones((B, L), jnp.int32)
    cross_attn = jax.random.uniform(ka, (B, H, T, L - 1), jnp.float32)   # unused in linear_states
    previous_keep_mask = jnp.ones((B, L - 1), jnp.float32)

    new_img_states, new_img_mask, prev_keep, (scores, topk_vals) = token_pruner_forward(
        params, config, 3, text_states, text_mask, image_states, image_mask,
        cross_attn, previous_keep_mask)

    jax.block_until_ready(new_img_states)
    jax.block_until_ready(new_img_mask)
    jax.block_until_ready(scores)

    # sanity: shapes + finiteness
    K = int(L * config.keep_ratio)
    assert new_img_states.shape == (B, K + 1, D)
    assert new_img_mask.shape == (B, K + 1)
    assert prev_keep.shape == (B, K)
    assert scores.shape == (B, L - 1)
    assert bool(jnp.all(jnp.isfinite(scores)))
    # log-softmax channel-0 scores must be <= 0
    assert bool(jnp.all(scores <= 1e-6))
    print("KERNEL_OK")
</pallas_src>

<mosaic_0001>
module attributes {stable_mosaic.version = 11 : i64} {
  func.func @_token_score_kernel(%arg0: i32, %arg1: memref<32x32xf32, #tpu.memory_space<vmem>>, %arg2: memref<2x32xf32, #tpu.memory_space<vmem>>, %arg3: memref<1x2xf32, #tpu.memory_space<vmem>>, %arg4: memref<32x1xf32, #tpu.memory_space<vmem>>) attributes {dimension_semantics = [#tpu.dimension_semantics<parallel>], iteration_bounds = array<i64: 1>, scalar_prefetch = 0 : i64, scratch_operands = 0 : i64, tpu.core_type = #tpu.core_type<tc>, window_params = [{transform_indices = @transform_0, window_bounds = array<i64: 32, 32>}, {pipeline_mode = #tpu.pipeline_mode<synchronous>, transform_indices = @transform_1, window_bounds = array<i64: 2, 32>}, {pipeline_mode = #tpu.pipeline_mode<synchronous>, transform_indices = @transform_2, window_bounds = array<i64: 1, 2>}, {transform_indices = @transform_3, window_bounds = array<i64: 32, 1>}]} {
    %c0 = arith.constant 0 : index
    %c0_0 = arith.constant 0 : index
    %0 = vector.load %arg1[%c0, %c0_0] : memref<32x32xf32, #tpu.memory_space<vmem>>, vector<32x32xf32>
    %cst = arith.constant dense<0.000000e+00> : vector<32xf32>
    %1 = vector.multi_reduction <add>, %0, %cst [1] : vector<32x32xf32> to vector<32xf32>
    %2 = vector.shape_cast %1 : vector<32xf32> to vector<32x1xf32>
    %cst_1 = arith.constant 3.200000e+01 : f32
    %3 = vector.broadcast %cst_1 : f32 to vector<32x1xf32>
    %4 = arith.divf %2, %3 : vector<32x1xf32>
    %5 = vector.broadcast %4 : vector<32x1xf32> to vector<32x32xf32>
    %6 = arith.subf %0, %5 : vector<32x32xf32>
    %7 = arith.mulf %6, %6 : vector<32x32xf32>
    %cst_2 = arith.constant dense<0.000000e+00> : vector<32xf32>
    %8 = vector.multi_reduction <add>, %7, %cst_2 [1] : vector<32x32xf32> to vector<32xf32>
    %9 = vector.shape_cast %8 : vector<32xf32> to vector<32x1xf32>
    %cst_3 = arith.constant 3.200000e+01 : f32
    %10 = vector.broadcast %cst_3 : f32 to vector<32x1xf32>
    %11 = arith.divf %9, %10 : vector<32x1xf32>
    %cst_4 = arith.constant 9.99999974E-6 : f32
    %12 = vector.broadcast %cst_4 : f32 to vector<32x1xf32>
    %13 = arith.addf %11, %12 : vector<32x1xf32>
    %14 = math.rsqrt %13 : vector<32x1xf32>
    %15 = vector.broadcast %14 : vector<32x1xf32> to vector<32x32xf32>
    %16 = arith.mulf %6, %15 : vector<32x32xf32>
    %c0_5 = arith.constant 0 : index
    %c0_6 = arith.constant 0 : index
    %17 = vector.load %arg2[%c0_5, %c0_6] : memref<2x32xf32, #tpu.memory_space<vmem>>, vector<2x32xf32>
    %c0_7 = arith.constant 0 : index
    %c0_8 = arith.constant 0 : index
    %18 = vector.load %arg3[%c0_7, %c0_8] : memref<1x2xf32, #tpu.memory_space<vmem>>, vector<1x2xf32>
    %19 = vector.extract_strided_slice %17 {offsets = [0, 0], sizes = [1, 32], strides = [1, 1]} : vector<2x32xf32> to vector<1x32xf32>
    %20 = vector.broadcast %19 : vector<1x32xf32> to vector<32x32xf32>
    %21 = arith.mulf %16, %20 : vector<32x32xf32>
    %cst_9 = arith.constant dense<0.000000e+00> : vector<32xf32>
    %22 = vector.multi_reduction <add>, %21, %cst_9 [1] : vector<32x32xf32> to vector<32xf32>
    %23 = vector.shape_cast %22 : vector<32xf32> to vector<32x1xf32>
    %24 = vector.extract_strided_slice %18 {offsets = [0, 0], sizes = [1, 1], strides = [1, 1]} : vector<1x2xf32> to vector<1x1xf32>
    %25 = vector.broadcast %24 : vector<1x1xf32> to vector<32x1xf32>
    %26 = arith.addf %23, %25 : vector<32x1xf32>
    %27 = vector.extract_strided_slice %17 {offsets = [1, 0], sizes = [1, 32], strides = [1, 1]} : vector<2x32xf32> to vector<1x32xf32>
    %28 = vector.broadcast %27 : vector<1x32xf32> to vector<32x32xf32>
    %29 = arith.mulf %16, %28 : vector<32x32xf32>
    %cst_10 = arith.constant dense<0.000000e+00> : vector<32xf32>
    %30 = vector.multi_reduction <add>, %29, %cst_10 [1] : vector<32x32xf32> to vector<32xf32>
    %31 = vector.shape_cast %30 : vector<32xf32> to vector<32x1xf32>
    %32 = vector.extract_strided_slice %18 {offsets = [0, 1], sizes = [1, 1], strides = [1, 1]} : vector<1x2xf32> to vector<1x1xf32>
    %33 = vector.broadcast %32 : vector<1x1xf32> to vector<32x1xf32>
    %34 = arith.addf %31, %33 : vector<32x1xf32>
    %35 = arith.maximumf %26, %34 : vector<32x1xf32>
    %36 = arith.subf %26, %35 : vector<32x1xf32>
    %37 = math.exp %36 : vector<32x1xf32>
    %38 = arith.subf %34, %35 : vector<32x1xf32>
    %39 = math.exp %38 : vector<32x1xf32>
    %40 = arith.addf %37, %39 : vector<32x1xf32>
    %41 = math.log %40 : vector<32x1xf32>
    %42 = arith.addf %35, %41 : vector<32x1xf32>
    %43 = arith.subf %26, %42 : vector<32x1xf32>
    %c0_11 = arith.constant 0 : index
    %c0_12 = arith.constant 0 : index
    %44 = vector.load %arg4[%c0_11, %c0_12] : memref<32x1xf32, #tpu.memory_space<vmem>>, vector<32x1xf32>
    tpu.vector_store %arg4[%c0_11, %c0_12], %43 {strides = array<i32>} : memref<32x1xf32, #tpu.memory_space<vmem>>, vector<32x1xf32>,
    return
  }
  func.func @transform_0(%arg0: i32) -> (i32, i32) {
    %c0_i32 = arith.constant 0 : i32
    %c0_i32_0 = arith.constant 0 : i32
    return %arg0, %c0_i32 : i32, i32
  }
  func.func @transform_1(%arg0: i32) -> (i32, i32) {
    %c0_i32 = arith.constant 0 : i32
    %c0_i32_0 = arith.constant 0 : i32
    %c0_i32_1 = arith.constant 0 : i32
    return %c0_i32, %c0_i32_0 : i32, i32
  }
  func.func @transform_2(%arg0: i32) -> (i32, i32) {
    %c0_i32 = arith.constant 0 : i32
    %c0_i32_0 = arith.constant 0 : i32
    %c0_i32_1 = arith.constant 0 : i32
    return %c0_i32, %c0_i32_0 : i32, i32
  }
  func.func @transform_3(%arg0: i32) -> (i32, i32) {
    %c0_i32 = arith.constant 0 : i32
    %c0_i32_0 = arith.constant 0 : i32
    return %arg0, %c0_i32 : i32, i32
  }
}

</mosaic_0001>

<bundles_post_ra>
// kernel: tpu_custom_call.1
= control target key start
LH: loop header
LB: loop body
LE: loop exit
PB: predicated region body
PF: predicated region fallthrough
CT: control target
= control target key end

     0   :  { %8 = vsyncpa [#allocation3], 0  ;;  %s310_s12 = smov [#allocation2]   ;;  %s433_s0 = inlined_call_operand.hbm [shape: f32[32,32], index: 0, kind: input, shape index: {}]   ;;  %s434_s1 = inlined_call_operand.vmem [shape: f32[2,32], index: 1, kind: input, shape index: {}]   ;;  %s435_s2 = inlined_call_operand.vmem [shape: f32[1,2], index: 2, kind: input, shape index: {}]   ;;  %s436_s3 = inlined_call_operand.vmem [shape: f32[32,1], index: 3, kind: output, shape index: {}]  }
   0x1   :  { %s14_s13 = sshll.u32 %s310_s12, 4  ;;  %s286_s16 = scalar_lea.hbm %s433_s0, 512  ;;  %s15_s13 = int_to_ptr.vmem [resolvable:$true] %s14_s13 }
   0x2   :  { %p287_p0 = scmp.ne.s32.totalorder %s433_s0, %s286_s16  ;;  %p290_p1 = scmp.lt.u32.totalorder %s286_s16, %s433_s0 }
   0x4   :  { %p292_p2 = pnand %p290_p1, %p287_p0 }
   0x6   :  { %295 = shalt.err (!%p292_p2)
}
   0x7   :  { %s296_s21 = scalar_lea.vmem %s15_s13, 512  ;;  %p301_p4 = scmp.lt.s32.totalorder %s15_s13, %s15_s13 }
   0x8   :  { %p297_p3 = scmp.ne.s32.totalorder %s15_s13, %s296_s21  ;;  %p302_p5 = scmp.lt.s32.totalorder %s296_s21, %s296_s21 }
   0xa   :  { %p303_p6 = por %p302_p5, %p301_p4 }
   0xc   :  { %p304_p7 = pnand %p303_p6, %p297_p3 }
   0xe   :  { %307 = shalt.err (!%p304_p7)
}
   0xf   :  { %s311_s22 = smov 128   ;;  %s312_s23 = smov 8  }
  0x10   :  { %20 = dma.hbm_to_vmem [thread:$0]  %s433_s0, 512, %s15_s13, [#allocation3], %s311_s22, %s311_s22, %s312_s23  }
  0x11   :  { %308 = dma.done.wait [#allocation3], 512  }
  0x12   :  { %309 = vsyncadd [#allocation3], 4294966784  ;;  %vm32_vm0 = vcmask 261120   ;;  %v28_v0 = vld [vmem:[#allocation2] sm:$0xff]  ;;  %v30_v1 = vld [vmem:[#allocation2 + $0x10] sm:$0xff]  ;;  %v88_v30 = vlaneseq  ;;  %s313_s28 = smov 127  }
  0x13   :  { %v29_v2 = vld [vmem:[#allocation2 + $0x8] sm:$0xff]  ;;  %v33_v3 = vsel %vm32_vm0, %v28_v0, 0.0  ;;  %v39_v4 = vsel %vm32_vm0, %v30_v1, 0.0  ;;  %v31_v5 = vld [vmem:[#allocation2 + $0x18] sm:$0xff]  ;;  %v86_v43 = vld [vmem:[%s434_s1] sm:$0x3] }
  0x14   :  { %34 = vadd.xlane.f32.xlu0 %v33_v3  ;;  %40 = vadd.xlane.f32.xlu1 %v39_v4  ;;  %v36_v6 = vsel %vm32_vm0, %v29_v2, 0.0  ;;  %v42_v7 = vsel %vm32_vm0, %v31_v5, 0.0  ;;  %v89_v36 = vshrl.u32 %v88_v30, 7  ;;  %vm238_vm1 = vcmask 7168  }
  0x16   :  { %v120_v41 = vsub.s32 1, %v89_v36  ;;  %v90_v47 = vsub.s32 0, %v89_v36 }
  0x18   :  { %37 = vadd.xlane.f32.xlu0 %v36_v6  ;;  %43 = vadd.xlane.f32.xlu1 %v42_v7  ;;  %v121_v44 = vrot.slane %v86_v43, %v120_v41  ;;  %v91_v54 = vrot.slane %v86_v43, %v90_v47  ;;  %v248_v7 = vld [vmem:[%s435_s2] ss:$0 sm:$0xff]  ;;  %s314_s2 = smov 1  }
  0xa1   :  { %v35_v8 = vpop.xlane.xlu0 %34  ;;  %v41_v9 = vpop.xlane.xlu1 %40 }
  0xa2   :  { %v46_v10 = vmul.f32 0.03125, %v35_v8  ;;  %v48_v11 = vmul.f32 0.03125, %v41_v9 }
  0xa4   :  { %v50_v12 = vsub.f32 %v28_v0, %v46_v10  ;;  %v52_v13 = vsub.f32 %v30_v1, %v48_v11 }
  0xa5   :  { %v38_v14 = vpop.xlane.xlu0 %37  ;;  %v44_v15 = vpop.xlane.xlu1 %43 }
  0xa6   :  { %v47_v16 = vmul.f32 0.03125, %v38_v14  ;;  %v49_v17 = vmul.f32 0.03125, %v44_v15  ;;  %v54_v18 = vmul.f32 %v50_v12, %v50_v12  ;;  %v56_v19 = vmul.f32 %v52_v13, %v52_v13 }
  0xa8   :  { %v51_v20 = vsub.f32 %v29_v2, %v47_v16  ;;  %v53_v21 = vsub.f32 %v31_v5, %v49_v17  ;;  %v58_v22 = vsel %vm32_vm0, %v54_v18, 0.0  ;;  %v64_v23 = vsel %vm32_vm0, %v56_v19, 0.0 }
  0xa9   :  { %59 = vadd.xlane.f32.xlu0 %v58_v22 }
  0xaa   :  { %v55_v24 = vmul.f32 %v51_v20, %v51_v20  ;;  %v57_v25 = vmul.f32 %v53_v21, %v53_v21 }
  0xac   :  { %v61_v26 = vsel %vm32_vm0, %v55_v24, 0.0  ;;  %v67_v27 = vsel %vm32_vm0, %v57_v25, 0.0 }
  0xad   :  { %65 = vadd.xlane.f32.xlu0 %v64_v23  ;;  %62 = vadd.xlane.f32.xlu1 %v61_v26 }
  0xb1   :  { %68 = vadd.xlane.f32.xlu1 %v67_v27 }
 0x136   :  { %v60_v28 = vpop.xlane.xlu0 %59 }
 0x137   :  { %v70_v29 = vmul.f32 0.03125, %v60_v28 }
 0x139   :  { %v74_v31 = vadd.f32 1e-05, %v70_v29 }
 0x13a   :  { %v63_v32 = vpop.xlane.xlu1 %62  ;;  %v66_v33 = vpop.xlane.xlu0 %65 }
 0x13b   :  { %254 = vrsqrt.f32 %v74_v31  ;;  %v71_v34 = vmul.f32 0.03125, %v63_v32  ;;  %v72_v35 = vmul.f32 0.03125, %v66_v33 }
 0x13d   :  { %v75_v37 = vadd.f32 1e-05, %v71_v34  ;;  %v76_v38 = vadd.f32 1e-05, %v72_v35 }
 0x13e   :  { %v69_v39 = vpop.xlane.xlu1 %68 }
 0x13f   :  { %256 = vrsqrt.f32 %v75_v37  ;;  %v73_v40 = vmul.f32 0.03125, %v69_v39 }
 0x140   :  { %258 = vrsqrt.f32 %v76_v38 }
 0x141   :  { %v77_v42 = vadd.f32 1e-05, %v73_v40 }
 0x143   :  { %260 = vrsqrt.f32 %v77_v42 }
 0x145   :  { %v255_v45 = vpop.eup %254 }
 0x146   :  { %v82_v46 = vmul.f32 %v255_v45, %v50_v12 }
 0x148   :  { %v122_v48 = vmul.f32 %v121_v44, %v82_v46  ;;  %v92_v61 = vmul.f32 %v91_v54, %v82_v46 }
 0x149   :  { %v257_v49 = vpop.eup %256 }
 0x14a   :  { %v259_v50 = vpop.eup %258  ;;  %v126_v51 = vsel %vm32_vm0, %v122_v48, 0.0  ;;  %v83_v52 = vmul.f32 %v257_v49, %v51_v20  ;;  %v96_v1 = vsel %vm32_vm0, %v92_v61, 0.0 }
 0x14b   :  { %127 = vadd.xlane.f32.xlu0 %v126_v51  ;;  %v84_v53 = vmul.f32 %v259_v50, %v52_v13 }
 0x14c   :  { %v123_v55 = vmul.f32 %v121_v44, %v83_v52  ;;  %v93_v0 = vmul.f32 %v91_v54, %v83_v52 }
 0x14d   :  { %v261_v56 = vpop.eup %260  ;;  %v124_v57 = vmul.f32 %v121_v44, %v84_v53  ;;  %v94_v2 = vmul.f32 %v91_v54, %v84_v53 }
 0x14e   :  { %v129_v58 = vsel %vm32_vm0, %v123_v55, 0.0  ;;  %v85_v59 = vmul.f32 %v261_v56, %v53_v21  ;;  %v99_v3 = vsel %vm32_vm0, %v93_v0, 0.0 }
 0x14f   :  { %130 = vadd.xlane.f32.xlu1 %v129_v58  ;;  %v132_v60 = vsel %vm32_vm0, %v124_v57, 0.0  ;;  %v102_v5 = vsel %vm32_vm0, %v94_v2, 0.0 }
 0x150   :  { %133 = vadd.xlane.f32.xlu0 %v132_v60  ;;  %v125_v62 = vmul.f32 %v121_v44, %v85_v59  ;;  %v95_v4 = vmul.f32 %v91_v54, %v85_v59 }
 0x152   :  { %v135_v63 = vsel %vm32_vm0, %v125_v62, 0.0  ;;  %v105_v6 = vsel %vm32_vm0, %v95_v4, 0.0 }
 0x153   :  { %136 = vadd.xlane.f32.xlu1 %v135_v63 }
 0x154   :  { %97 = vadd.xlane.f32.xlu0 %v96_v1 }
 0x157   :  { %100 = vadd.xlane.f32.xlu1 %v99_v3 }
 0x158   :  { %103 = vadd.xlane.f32.xlu0 %v102_v5 }
 0x15b   :  { %106 = vadd.xlane.f32.xlu1 %v105_v6 }
 0x1d8   :  { %v128_v8 = vpop.xlane.xlu0 %127 }
 0x1d9   :  { %v138_v9 = vadd.f32 %v248_v7, %v128_v8 }
 0x1db   :  { %146 = vrot.lane.b32.xlu0 %v138_v9, %s313_s28 }
 0x1dc   :  { %v131_v10 = vpop.xlane.xlu1 %130 }
 0x1dd   :  { %v139_v11 = vadd.f32 %v248_v7, %v131_v10  ;;  %v134_v12 = vpop.xlane.xlu0 %133 }
 0x1de   :  { %v140_v13 = vadd.f32 %v248_v7, %v134_v12 }
 0x1df   :  { %148 = vrot.lane.b32.xlu1 %v139_v11, %s313_s28 }
 0x1e0   :  { %v137_v14 = vpop.xlane.xlu1 %136 }
 0x1e1   :  { %v141_v15 = vadd.f32 %v248_v7, %v137_v14  ;;  %v98_v16 = vpop.xlane.xlu0 %97 }
 0x1e2   :  { %v373_v19 = vadd.f32 %v248_v7, %v98_v16 }
 0x1e3   :  { %150 = vrot.lane.b32.xlu1 %v140_v13, %s313_s28 }
 0x1e4   :  { %v101_v17 = vpop.xlane.xlu1 %100 }
 0x1e5   :  { %v104_v18 = vpop.xlane.xlu0 %103  ;;  %v378_v23 = vadd.f32 %v248_v7, %v101_v17 }
 0x1e6   :  { %v384_v26 = vadd.f32 %v248_v7, %v104_v18 }
 0x1e7   :  { %152 = vrot.lane.b32.xlu1 %v141_v15, %s313_s28 }
 0x1e8   :  { %v107_v20 = vpop.xlane.xlu1 %106 }
 0x1e9   :  { %v390_v29 = vadd.f32 %v248_v7, %v107_v20 }
 0x24d   :  { %v147_v21 = vpop.permute.xlu0 %146 }
 0x24e   :  { %v376_v22 = vmax.f32 %v373_v19, %v147_v21 }
 0x250   :  { %178 = vrot.lane.b32.xlu0 %v376_v22, %s314_s2  ;;  %v162_v48 = vsub.f32 %v373_v19, %v376_v22 }
 0x251   :  { %v149_v24 = vpop.permute.xlu1 %148 }
 0x252   :  { %v382_v25 = vmax.f32 %v378_v23, %v149_v24  ;;  %v166_v49 = vmul.f32 1.442695, %v162_v48 }
 0x254   :  { %180 = vrot.lane.b32.xlu1 %v382_v25, %s314_s2  ;;  %v163_v50 = vsub.f32 %v378_v23, %v382_v25 }
 0x255   :  { %v151_v27 = vpop.permute.xlu1 %150 }
 0x256   :  { %v388_v28 = vmax.f32 %v384_v26, %v151_v27  ;;  %v168_v51 = vmul.f32 1.442695, %v163_v50 }
 0x258   :  { %182 = vrot.lane.b32.xlu0 %v388_v28, %s314_s2  ;;  %v164_v52 = vsub.f32 %v384_v26, %v388_v28 }
 0x259   :  { %v153_v30 = vpop.permute.xlu1 %152 }
 0x25a   :  { %v394_v31 = vmax.f32 %v390_v29, %v153_v30  ;;  %v170_v53 = vmul.f32 1.442695, %v164_v52 }
 0x25c   :  { %184 = vrot.lane.b32.xlu1 %v394_v31, %s314_s2  ;;  %v165_v54 = vsub.f32 %v390_v29, %v394_v31 }
 0x25e   :  { %v172_v55 = vmul.f32 1.442695, %v165_v54 }
 0x2c2   :  { %v179_v32 = vpop.permute.xlu0 %178 }
 0x2c3   :  { %v190_v33 = vsub.f32 %v138_v9, %v179_v32 }
 0x2c5   :  { %v194_v34 = vmul.f32 1.442695, %v190_v33 }
 0x2c6   :  { %v181_v35 = vpop.permute.xlu1 %180 }
 0x2c7   :  { %262 = vpow2.f32 %v194_v34  ;;  %v191_v36 = vsub.f32 %v139_v11, %v181_v35 }
 0x2c9   :  { %v196_v37 = vmul.f32 1.442695, %v191_v36 }
 0x2ca   :  { %v183_v38 = vpop.permute.xlu0 %182 }
 0x2cb   :  { %264 = vpow2.f32 %v196_v37  ;;  %v192_v39 = vsub.f32 %v140_v13, %v183_v38 }
 0x2cd   :  { %v198_v40 = vmul.f32 1.442695, %v192_v39 }
 0x2ce   :  { %v185_v41 = vpop.permute.xlu1 %184 }
 0x2cf   :  { %266 = vpow2.f32 %v198_v40  ;;  %v193_v42 = vsub.f32 %v141_v15, %v185_v41 }
 0x2d1   :  { %v263_v43 = vpop.eup %262  ;;  %v200_v44 = vmul.f32 1.442695, %v193_v42 }
 0x2d2   :  { %206 = vrot.lane.b32.xlu0 %v263_v43, %s313_s28 }
 0x2d3   :  { %268 = vpow2.f32 %v200_v44 }
 0x2d4   :  { %270 = vpow2.f32 %v166_v49 }
 0x2d5   :  { %v265_v45 = vpop.eup %264  ;;  %272 = vpow2.f32 %v168_v51 }
 0x2d6   :  { %208 = vrot.lane.b32.xlu1 %v265_v45, %s313_s28  ;;  %274 = vpow2.f32 %v170_v53 }
 0x2d7   :  { %276 = vpow2.f32 %v172_v55 }
 0x2d9   :  { %v267_v46 = vpop.eup %266 }
 0x2da   :  { %210 = vrot.lane.b32.xlu0 %v267_v46, %s313_s28 }
 0x2dd   :  { %v269_v47 = vpop.eup %268 }
 0x2de   :  { %212 = vrot.lane.b32.xlu1 %v269_v47, %s313_s28  ;;  %v271_v56 = vpop.eup %270 }
 0x2df   :  { %v273_v59 = vpop.eup %272 }
 0x2e0   :  { %v275_v62 = vpop.eup %274 }
 0x2e1   :  { %v277_v1 = vpop.eup %276 }
 0x344   :  { %v207_v57 = vpop.permute.xlu0 %206 }
 0x345   :  { %v218_v58 = vadd.f32 %v271_v56, %v207_v57 }
 0x347   :  { %278 = vlog2.f32 %v218_v58 }
 0x348   :  { %v209_v60 = vpop.permute.xlu1 %208 }
 0x349   :  { %v219_v61 = vadd.f32 %v273_v59, %v209_v60 }
 0x34b   :  { %280 = vlog2.f32 %v219_v61 }
 0x34c   :  { %v211_v63 = vpop.permute.xlu0 %210 }
 0x34d   :  { %v220_v0 = vadd.f32 %v275_v62, %v211_v63 }
 0x34f   :  { %282 = vlog2.f32 %v220_v0 }
 0x350   :  { %v213_v2 = vpop.permute.xlu1 %212 }
 0x351   :  { %v279_v3 = vpop.eup %278  ;;  %v221_v4 = vadd.f32 %v277_v1, %v213_v2 }
 0x352   :  { %v223_v5 = vmul.f32 0.6931472, %v279_v3 }
 0x353   :  { %284 = vlog2.f32 %v221_v4 }
 0x354   :  { %v230_v6 = vadd.f32 %v223_v5, %v376_v22 }
 0x355   :  { %v281_v7 = vpop.eup %280 }
 0x356   :  { %v234_v8 = vsub.f32 %v373_v19, %v230_v6  ;;  %v225_v9 = vmul.f32 0.6931472, %v281_v7 }
 0x358   :  { %239 = vst.msk [vmem:[%s436_s3] sm:$0xff] %vm238_vm1, %v234_v8  ;;  %v231_v10 = vadd.f32 %v225_v9, %v382_v25 }
 0x359   :  { %v283_v11 = vpop.eup %282 }
 0x35a   :  { %v235_v12 = vsub.f32 %v378_v23, %v231_v10  ;;  %v227_v13 = vmul.f32 0.6931472, %v283_v11 }
 0x35c   :  { %240 = vst.msk [vmem:[%s436_s3 + $0x8] sm:$0xff] %vm238_vm1, %v235_v12  ;;  %v232_v14 = vadd.f32 %v227_v13, %v388_v28 }
 0x35d   :  { %v285_v15 = vpop.eup %284 }
 0x35e   :  { %v236_v16 = vsub.f32 %v384_v26, %v232_v14  ;;  %v229_v17 = vmul.f32 0.6931472, %v285_v15 }
 0x360   :  { %241 = vst.msk [vmem:[%s436_s3 + $0x10] sm:$0xff] %vm238_vm1, %v236_v16  ;;  %v233_v18 = vadd.f32 %v229_v17, %v394_v31 }
 0x362   :  { %v237_v19 = vsub.f32 %v390_v29, %v233_v18 }
 0x364   :  { %242 = vst.msk [vmem:[%s436_s3 + $0x18] sm:$0xff] %vm238_vm1, %v237_v19 }
 0x365   :  { %247 = vsyncpa [#allocation3], 1 }

</bundles_post_ra>
